<compile_context>
chip_gen: v7x
topology: tpu7x:2x2x1
jax: 0.10.0
libtpu: 0.0.40
codegen_flags: <defaults>
</compile_context>

<pallas_src>
import functools

import jax
import jax.numpy as jnp
from jax.experimental import pallas as pl
from jax.experimental.pallas import tpu as pltpu

# gray_coeffs = [65.738, 129.057, 25.064] / 256  (deterministic module constant)
GRAY_COEFFS = (65.738 / 256.0, 129.057 / 256.0, 25.064 / 256.0)

# Per-input block budget: 2 inputs x 2 pipeline buffers x this stays well below
# the scoped-VMEM limit on v5e/v6e/v7x while keeping each grid step's HBM
# traffic large enough to sit near the HBM roofline.
_TARGET_BLOCK_BYTES = 2 * 1024 * 1024
_VMEM_LIMIT_BYTES = 32 * 1024 * 1024


def _choose_tiles(N, H, W, itemsize):
    """Pick (NB, TH): batch elements per grid step and row-tile height."""
    row_bytes = 3 * W * itemsize
    th = max(1, _TARGET_BLOCK_BYTES // row_bytes)
    if th >= H:
        # Whole frame fits in one block; pack several batch elements per step.
        frame_bytes = 3 * H * W * itemsize
        nb_max = max(1, _TARGET_BLOCK_BYTES // frame_bytes)
        nb = 1
        for d in range(1, N + 1):  # largest divisor of N within budget
            if N % d == 0 and d <= nb_max:
                nb = d
        return nb, H
    th = max(8, (th // 8) * 8)     # respect the (8, 128) sublane constraint
    return 1, min(th, H)


def _psnr_partial_kernel(sr_ref, hr_ref, out_ref, *, pixel_range,
                         inv_pixel_range, c0, c1, c2, shave, H):
    nb, _, th, w = sr_ref.shape          # block shape (NB, 3, TH, W); w == full W
    row0 = pl.program_id(1) * th         # global row offset of this tile

    sr = sr_ref[...].astype(jnp.float32)
    hr = hr_ref[...].astype(jnp.float32)

    # quantize(sr, rgb_range): *pixel_range, clip [0, 255], round, /pixel_range
    # (the trailing divide is folded into the constant inv_pixel_range).
    sr_q = jnp.round(jnp.clip(sr * pixel_range, 0.0, 255.0)) * inv_pixel_range

    # gray = sum_c coeff_c * (sr_q - hr)_c / rgb_range; 1/rgb_range is folded
    # into c0/c1/c2, so this is pure mul/add on the VPU.
    d = sr_q - hr                                        # (NB, 3, TH, W)
    gray = c0 * d[:, 0] + c1 * d[:, 1] + c2 * d[:, 2]    # (NB, TH, W)

    # Valid region: rows/cols in [shave, dim - shave).  The row upper bound
    # also masks padded rows of a ragged last row-tile (row >= H).  Select,
    # not multiply, so garbage (NaN/Inf) in padded rows cannot leak in.
    rows = row0 + jax.lax.broadcasted_iota(jnp.int32, (th, w), 0)
    cols = jax.lax.broadcasted_iota(jnp.int32, (th, w), 1)
    valid = ((rows >= shave) & (rows < H - shave)
             & (cols >= shave) & (cols < w - shave))
    g2 = jnp.where(valid[None], gray * gray, 0.0)

    partial = jnp.sum(g2)

    # Write this block's partial into element (0, 0) of its private (8, 128)
    # output tile; the wrapper sums all tiles.  No cross-step carry -> both
    # grid axes stay "parallel" (megacore-friendly).
    r = jax.lax.broadcasted_iota(jnp.int32, (8, 128), 0)
    c = jax.lax.broadcasted_iota(jnp.int32, (8, 128), 1)
    out_ref[...] = jnp.where((r == 0) & (c == 0), partial, 0.0)


def psnr_ycbcr(sr, hr, scale, rgb_range):
    """Pallas equivalent of PSNR_ycbcr.forward(sr, hr, scale, rgb_range).

    scale and rgb_range are static Python numbers (as in the PyTorch call)."""
    N, C, H, W = sr.shape
    assert C == 3, "gray_coeffs has 3 channels"
    assert hr.shape == sr.shape

    pixel_range = 255.0 / float(rgb_range)
    # PyTorch: shave = scale if scale != 1 else scale + 6, but when scale == 1
    # `valid = diff` (no shave is applied), so the effective shave is 0.
    if scale == 1:
        shave = 0
        Hv, Wv = H, W
    else:
        shave = int(scale)
        Hv, Wv = H - 2 * shave, W - 2 * shave
    count = float(N * Hv * Wv)

    inv_rgb = 1.0 / float(rgb_range)
    c0, c1, c2 = (g * inv_rgb for g in GRAY_COEFFS)

    itemsize = jnp.dtype(sr.dtype).itemsize
    NB, TH = _choose_tiles(N, H, W, itemsize)
    GN = N // NB
    GH = pl.cdiv(H, TH)

    kernel = functools.partial(
        _psnr_partial_kernel,
        pixel_range=pixel_range,
        inv_pixel_range=1.0 / pixel_range,
        c0=c0, c1=c1, c2=c2,
        shave=shave,
        H=H,
    )

    partials = pl.pallas_call(
        kernel,
        out_shape=jax.ShapeDtypeStruct((GN * 8, GH * 128), jnp.float32),
        grid_spec=pltpu.PrefetchScalarGridSpec(
            num_scalar_prefetch=0,
            grid=(GN, GH),
            in_specs=[
                pl.BlockSpec((NB, 3, TH, W), lambda nb, hb: (nb, 0, hb, 0)),
                pl.BlockSpec((NB, 3, TH, W), lambda nb, hb: (nb, 0, hb, 0)),
            ],
            out_specs=pl.BlockSpec((8, 128), lambda nb, hb: (nb, hb)),
        ),
        compiler_params=pltpu.CompilerParams(
            dimension_semantics=("parallel", "parallel"),
            vmem_limit_bytes=_VMEM_LIMIT_BYTES,
        ),
    )(sr, hr)

    # Final reduction + PSNR in the wrapper (cheap: GN*GH nonzero partials).
    mse = jnp.sum(partials) / count
    return -10.0 * jnp.log10(mse)


def _psnr_ref(sr, hr, scale, rgb_range):
    """Pure-JAX reference mirroring the PyTorch forward."""
    pixel_range = 255.0 / rgb_range
    sr_q = jnp.round(jnp.clip(sr * pixel_range, 0.0, 255.0)) / pixel_range
    coeffs = jnp.array(GRAY_COEFFS, jnp.float32).reshape(1, 3, 1, 1)
    diff = (sr_q.astype(jnp.float32) - hr.astype(jnp.float32)) / rgb_range
    gray = (diff * coeffs).sum(1)
    if scale == 1:
        valid = gray
    else:
        s = scale
        valid = gray[..., s:-s, s:-s]
    mse = jnp.mean(valid ** 2)
    return -10.0 * jnp.log10(mse)


if __name__ == "__main__":
    key = jax.random.PRNGKey(0)
    k1, k2 = jax.random.split(key)

    N, C, H, W = 2, 3, 16, 16
    rgb_range = 255
    scale = 2

    sr = jax.random.uniform(k1, (N, C, H, W), jnp.float32) * rgb_range
    hr = jax.random.uniform(k2, (N, C, H, W), jnp.float32) * rgb_range

    out = psnr_ycbcr(sr, hr, scale, rgb_range)
    out = jax.block_until_ready(out)

    ref = _psnr_ref(sr, hr, scale, rgb_range)
    assert jnp.allclose(out, ref, rtol=1e-4, atol=1e-4), (out, ref)

    print("KERNEL_OK")
</pallas_src>

<mosaic_0001>
module attributes {stable_mosaic.version = 11 : i64} {
  func.func @_psnr_partial_kernel(%arg0: i32, %arg1: i32, %arg2: memref<2x3x16x16xf32, #tpu.memory_space<vmem>>, %arg3: memref<2x3x16x16xf32, #tpu.memory_space<vmem>>, %arg4: memref<8x128xf32, #tpu.memory_space<vmem>>) attributes {dimension_semantics = [#tpu.dimension_semantics<parallel>, #tpu.dimension_semantics<parallel>], iteration_bounds = array<i64: 1, 1>, scalar_prefetch = 0 : i64, scratch_operands = 0 : i64, tpu.core_type = #tpu.core_type<tc>, window_params = [{transform_indices = @transform_0, window_bounds = array<i64: 2, 3, 16, 16>}, {transform_indices = @transform_1, window_bounds = array<i64: 2, 3, 16, 16>}, {transform_indices = @transform_2, window_bounds = array<i64: 8, 128>}]} {
    %c16_i32 = arith.constant 16 : i32
    %0 = arith.muli %arg1, %c16_i32 : i32
    %c0 = arith.constant 0 : index
    %c0_0 = arith.constant 0 : index
    %c0_1 = arith.constant 0 : index
    %c0_2 = arith.constant 0 : index
    %1 = vector.load %arg2[%c0, %c0_0, %c0_1, %c0_2] : memref<2x3x16x16xf32, #tpu.memory_space<vmem>>, vector<2x3x16x16xf32>
    %c0_3 = arith.constant 0 : index
    %c0_4 = arith.constant 0 : index
    %c0_5 = arith.constant 0 : index
    %c0_6 = arith.constant 0 : index
    %2 = vector.load %arg3[%c0_3, %c0_4, %c0_5, %c0_6] : memref<2x3x16x16xf32, #tpu.memory_space<vmem>>, vector<2x3x16x16xf32>
    %cst = arith.constant 1.000000e+00 : f32
    %3 = vector.broadcast %cst : f32 to vector<2x3x16x16xf32>
    %4 = arith.mulf %1, %3 : vector<2x3x16x16xf32>
    %cst_7 = arith.constant 0.000000e+00 : f32
    %cst_8 = arith.constant 2.550000e+02 : f32
    %5 = vector.broadcast %cst_7 : f32 to vector<2x3x16x16xf32>
    %6 = arith.maximumf %5, %4 : vector<2x3x16x16xf32>
    %7 = vector.broadcast %cst_8 : f32 to vector<2x3x16x16xf32>
    %8 = arith.minimumf %7, %6 : vector<2x3x16x16xf32>
    %9 = math.roundeven %8 : vector<2x3x16x16xf32>
    %cst_9 = arith.constant 1.000000e+00 : f32
    %10 = vector.broadcast %cst_9 : f32 to vector<2x3x16x16xf32>
    %11 = arith.mulf %9, %10 : vector<2x3x16x16xf32>
    %12 = arith.subf %11, %2 : vector<2x3x16x16xf32>
    %13 = vector.extract_strided_slice %12 {offsets = [0, 0, 0, 0], sizes = [2, 1, 16, 16], strides = [1, 1, 1, 1]} : vector<2x3x16x16xf32> to vector<2x1x16x16xf32>
    %14 = vector.shape_cast %13 : vector<2x1x16x16xf32> to vector<2x16x16xf32>
    %cst_10 = arith.constant 0.00100701593 : f32
    %15 = vector.broadcast %cst_10 : f32 to vector<2x16x16xf32>
    %16 = arith.mulf %15, %14 : vector<2x16x16xf32>
    %17 = vector.extract_strided_slice %12 {offsets = [0, 1, 0, 0], sizes = [2, 1, 16, 16], strides = [1, 1, 1, 1]} : vector<2x3x16x16xf32> to vector<2x1x16x16xf32>
    %18 = vector.shape_cast %17 : vector<2x1x16x16xf32> to vector<2x16x16xf32>
    %cst_11 = arith.constant 0.00197697617 : f32
    %19 = vector.broadcast %cst_11 : f32 to vector<2x16x16xf32>
    %20 = arith.mulf %19, %18 : vector<2x16x16xf32>
    %21 = arith.addf %16, %20 : vector<2x16x16xf32>
    %22 = vector.extract_strided_slice %12 {offsets = [0, 2, 0, 0], sizes = [2, 1, 16, 16], strides = [1, 1, 1, 1]} : vector<2x3x16x16xf32> to vector<2x1x16x16xf32>
    %23 = vector.shape_cast %22 : vector<2x1x16x16xf32> to vector<2x16x16xf32>
    %cst_12 = arith.constant 3.83946084E-4 : f32
    %24 = vector.broadcast %cst_12 : f32 to vector<2x16x16xf32>
    %25 = arith.mulf %24, %23 : vector<2x16x16xf32>
    %26 = arith.addf %21, %25 : vector<2x16x16xf32>
    %27 = tpu.iota {dimensions = array<i32: 0>} : vector<16x16xi32>
    %28 = vector.broadcast %0 : i32 to vector<16x16xi32>
    %29 = arith.addi %28, %27 : vector<16x16xi32>
    %30 = tpu.iota {dimensions = array<i32: 1>} : vector<16x16xi32>
    %c2_i32 = arith.constant 2 : i32
    %31 = vector.broadcast %c2_i32 : i32 to vector<16x16xi32>
    %32 = arith.cmpi sge, %29, %31 : vector<16x16xi32>
    %c14_i32 = arith.constant 14 : i32
    %33 = vector.broadcast %c14_i32 : i32 to vector<16x16xi32>
    %34 = arith.cmpi slt, %29, %33 : vector<16x16xi32>
    %35 = arith.andi %32, %34 : vector<16x16xi1>
    %c2_i32_13 = arith.constant 2 : i32
    %36 = vector.broadcast %c2_i32_13 : i32 to vector<16x16xi32>
    %37 = arith.cmpi sge, %30, %36 : vector<16x16xi32>
    %38 = arith.andi %35, %37 : vector<16x16xi1>
    %c14_i32_14 = arith.constant 14 : i32
    %39 = vector.broadcast %c14_i32_14 : i32 to vector<16x16xi32>
    %40 = arith.cmpi slt, %30, %39 : vector<16x16xi32>
    %41 = arith.andi %38, %40 : vector<16x16xi1>
    %42 = vector.shape_cast %41 : vector<16x16xi1> to vector<1x16x16xi1>
    %43 = arith.mulf %26, %26 : vector<2x16x16xf32>
    %cst_15 = arith.constant 0.000000e+00 : f32
    %44 = vector.shape_cast %42 : vector<1x16x16xi1> to vector<1x16x16xi1>
    %45 = vector.broadcast %44 : vector<1x16x16xi1> to vector<2x16x16xi1>
    %46 = vector.broadcast %cst_15 : f32 to vector<2x16x16xf32>
    %47 = arith.select %45, %43, %46 : vector<2x16x16xi1>, vector<2x16x16xf32>
    %48 = vector.shape_cast %47 : vector<2x16x16xf32> to vector<1x2x16x16xf32>
    %cst_16 = arith.constant dense<0.000000e+00> : vector<1xf32>
    %49 = vector.multi_reduction <add>, %48, %cst_16 [1, 2, 3] : vector<1x2x16x16xf32> to vector<1xf32>
    %50 = vector.shape_cast %49 : vector<1xf32> to vector<1x1x1x1xf32>
    %51 = vector.extract %50[0, 0, 0, 0] : f32 from vector<1x1x1x1xf32>
    %52 = tpu.iota {dimensions = array<i32: 0>} : vector<8x128xi32>
    %53 = tpu.iota {dimensions = array<i32: 1>} : vector<8x128xi32>
    %c0_i32 = arith.constant 0 : i32
    %54 = vector.broadcast %c0_i32 : i32 to vector<8x128xi32>
    %55 = arith.cmpi eq, %52, %54 : vector<8x128xi32>
    %c0_i32_17 = arith.constant 0 : i32
    %56 = vector.broadcast %c0_i32_17 : i32 to vector<8x128xi32>
    %57 = arith.cmpi eq, %53, %56 : vector<8x128xi32>
    %58 = arith.andi %55, %57 : vector<8x128xi1>
    %cst_18 = arith.constant 0.000000e+00 : f32
    %59 = vector.broadcast %51 : f32 to vector<8x128xf32>
    %60 = vector.broadcast %cst_18 : f32 to vector<8x128xf32>
    %61 = arith.select %58, %59, %60 : vector<8x128xi1>, vector<8x128xf32>
    %c0_19 = arith.constant 0 : index
    %c0_20 = arith.constant 0 : index
    %62 = vector.load %arg4[%c0_19, %c0_20] : memref<8x128xf32, #tpu.memory_space<vmem>>, vector<8x128xf32>
    tpu.vector_store %arg4[%c0_19, %c0_20], %61 {strides = array<i32>} : memref<8x128xf32, #tpu.memory_space<vmem>>, vector<8x128xf32>,
    return
  }
  func.func @transform_0(%arg0: i32, %arg1: i32) -> (i32, i32, i32, i32) {
    %c0_i32 = arith.constant 0 : i32
    %c0_i32_0 = arith.constant 0 : i32
    %c0_i32_1 = arith.constant 0 : i32
    return %arg0, %c0_i32, %arg1, %c0_i32_0 : i32, i32, i32, i32
  }
  func.func @transform_1(%arg0: i32, %arg1: i32) -> (i32, i32, i32, i32) {
    %c0_i32 = arith.constant 0 : i32
    %c0_i32_0 = arith.constant 0 : i32
    %c0_i32_1 = arith.constant 0 : i32
    return %arg0, %c0_i32, %arg1, %c0_i32_0 : i32, i32, i32, i32
  }
  func.func @transform_2(%arg0: i32, %arg1: i32) -> (i32, i32) {
    %c0_i32 = arith.constant 0 : i32
    return %arg0, %arg1 : i32, i32
  }
}

</mosaic_0001>

<bundles_post_ra>
// kernel: tpu_custom_call.1
= control target key start
LH: loop header
LB: loop body
LE: loop exit
PB: predicated region body
PF: predicated region fallthrough
CT: control target
= control target key end

     0   :  { %7 = vsyncpa [#allocation3], 0  ;;  %s376_s0 = inlined_call_operand.hbm [shape: f32[2,3,16,16], index: 0, kind: input, shape index: {}]   ;;  %s377_s1 = inlined_call_operand.hbm [shape: f32[2,3,16,16], index: 1, kind: input, shape index: {}]   ;;  %s378_s2 = inlined_call_operand.hbm [shape: f32[8,128], index: 2, kind: output, shape index: {}]  }
   0x1   :  { %8 = vsyncpa [#allocation6], 0 }
   0x2   :  { %9 = vsyncpa [#allocation4], 0  ;;  %s295_s9 = smov [#allocation2]   ;;  %s223_s13 = scalar_lea.hbm %s376_s0, 1536 }
   0x3   :  { %s15_s10 = sshll.u32 %s295_s9, 4  ;;  %p224_p0 = scmp.ne.s32.totalorder %s376_s0, %s223_s13  ;;  %s16_s10 = int_to_ptr.vmem [resolvable:$true] %s15_s10 }
   0x4   :  { %p227_p1 = scmp.lt.u32.totalorder %s223_s13, %s376_s0 }
   0x6   :  { %p229_p2 = pnand %p227_p1, %p224_p0 }
   0x8   :  { %232 = shalt.err (!%p229_p2)
}
   0x9   :  { %s233_s18 = scalar_lea.vmem %s16_s10, 1536  ;;  %p238_p4 = scmp.lt.s32.totalorder %s16_s10, %s16_s10 }
   0xa   :  { %p234_p3 = scmp.ne.s32.totalorder %s16_s10, %s233_s18  ;;  %p239_p5 = scmp.lt.s32.totalorder %s233_s18, %s233_s18 }
   0xc   :  { %p240_p6 = por %p239_p5, %p238_p4 }
   0xe   :  { %p241_p7 = pnand %p240_p6, %p234_p3 }
  0x10   :  { %244 = shalt.err (!%p241_p7)
}
  0x11   :  { %s296_s19 = smov 128   ;;  %s297_s20 = smov 8  }
  0x12   :  { %21 = dma.hbm_to_vmem [thread:$0]  %s376_s0, 1536, %s16_s10, [#allocation3], %s296_s19, %s296_s19, %s297_s20  }
  0x13   :  { %s298_s23 = smov [#allocation5]   ;;  %s245_s27 = scalar_lea.hbm %s377_s1, 1536 }
  0x14   :  { %s27_s24 = sshll.u32 %s298_s23, 4  ;;  %p246_p8 = scmp.ne.s32.totalorder %s377_s1, %s245_s27  ;;  %s28_s24 = int_to_ptr.vmem [resolvable:$true] %s27_s24 }
  0x15   :  { %p249_p9 = scmp.lt.u32.totalorder %s245_s27, %s377_s1 }
  0x17   :  { %p251_p10 = pnand %p249_p9, %p246_p8 }
  0x19   :  { %254 = shalt.err (!%p251_p10)
}
  0x1a   :  { %s255_s4 = scalar_lea.vmem %s28_s24, 1536  ;;  %p260_p12 = scmp.lt.s32.totalorder %s28_s24, %s28_s24 }
  0x1b   :  { %p256_p11 = scmp.ne.s32.totalorder %s28_s24, %s255_s4  ;;  %p261_p13 = scmp.lt.s32.totalorder %s255_s4, %s255_s4 }
  0x1d   :  { %p262_p0 = por %p261_p13, %p260_p12 }
  0x1f   :  { %p263_p1 = pnand %p262_p0, %p256_p11 }
  0x21   :  { %266 = shalt.err (!%p263_p1)
}
  0x22   :  { %33 = dma.hbm_to_vmem [thread:$0]  %s377_s1, 1536, %s28_s24, [#allocation6], %s296_s19, %s296_s19, %s297_s20  }
  0x23   :  { %289 = dma.done.wait [#allocation3], 1536  }
  0x24   :  { %290 = vsyncadd [#allocation3], 4294965760 }
  0x25   :  { %291 = dma.done.wait [#allocation6], 1536  }
  0x26   :  { %292 = vsyncadd [#allocation6], 4294965760  ;;  %v133_v0 = vlaneseq  ;;  %v41_v2 = vld [vmem:[#allocation2] sm:$0xff]  ;;  %v42_v3 = vld [vmem:[#allocation2 + $0x8] sm:$0xff]  ;;  %vm165_vm8 = vcmask 130048   ;;  %s299_s1 = smov [#allocation7]  }
  0x27   :  { %v43_v4 = vld [vmem:[#allocation2 + $0x10] sm:$0xff]  ;;  %v44_v7 = vld [vmem:[#allocation2 + $0x18] sm:$0xff]  ;;  %v45_v8 = vld [vmem:[#allocation2 + $0x20] sm:$0xff]  ;;  %v65_v10 = vmax.f32 %v41_v2, 0.0  ;;  %v66_v11 = vmax.f32 %v42_v3, 0.0  ;;  %s194_s6 = sshll.u32 %s299_s1, 4  ;;  %s195_s6 = int_to_ptr.vmem [resolvable:$true] %s194_s6 }
  0x28   :  { %v339_v1 = vshrl.u32 %v133_v0, 7  ;;  %v344_v6 = vand.u32 127, %v133_v0  ;;  %v46_v9 = vld [vmem:[#allocation2 + $0x28] sm:$0xff]  ;;  %v67_v12 = vmax.f32 %v43_v4, 0.0  ;;  %v47_v13 = vld [vmem:[#allocation2 + $0x30] sm:$0xff]  ;;  %v48_v14 = vld [vmem:[#allocation2 + $0x38] sm:$0xff]  ;;  %p272_p3 = scmp.lt.s32.totalorder %s195_s6, %s195_s6 }
  0x29   :  { %v49_v15 = vld [vmem:[#allocation2 + $0x40] sm:$0xff]  ;;  %v68_v16 = vmax.f32 %v44_v7, 0.0  ;;  %v69_v17 = vmax.f32 %v45_v8, 0.0  ;;  %v70_v18 = vmax.f32 %v46_v9, 0.0  ;;  %v50_v19 = vld [vmem:[#allocation2 + $0x48] sm:$0xff]  ;;  %v51_v20 = vld [vmem:[#allocation2 + $0x50] sm:$0xff] }
  0x2a   :  { %v342_v5 = vadd.s32 8, %v339_v1  ;;  %v52_v21 = vld [vmem:[#allocation2 + $0x58] sm:$0xff]  ;;  %v71_v22 = vmax.f32 %v47_v13, 0.0  ;;  %v72_v23 = vmax.f32 %v48_v14, 0.0  ;;  %v73_v24 = vmax.f32 %v49_v15, 0.0  ;;  %v53_v34 = vld [vmem:[#allocation5] sm:$0xff] }
  0x2b   :  { %v74_v25 = vmax.f32 %v50_v19, 0.0  ;;  %v75_v26 = vmax.f32 %v51_v20, 0.0  ;;  %v76_v27 = vmax.f32 %v52_v21, 0.0  ;;  %v77_v28 = vmin.f32 %v65_v10, 255.0  ;;  %v54_v39 = vld [vmem:[#allocation5 + $0x8] sm:$0xff]  ;;  %v55_v40 = vld [vmem:[#allocation5 + $0x10] sm:$0xff] }
  0x2c   :  { %v78_v29 = vmin.f32 %v66_v11, 255.0  ;;  %v79_v30 = vmin.f32 %v67_v12, 255.0  ;;  %v80_v31 = vmin.f32 %v68_v16, 255.0  ;;  %v81_v32 = vmin.f32 %v69_v17, 255.0  ;;  %v56_v41 = vld [vmem:[#allocation5 + $0x18] sm:$0xff]  ;;  %v57_v46 = vld [vmem:[#allocation5 + $0x20] sm:$0xff] }
  0x2d   :  { %v82_v33 = vmin.f32 %v70_v18, 255.0  ;;  %vm141_vm0 = vcmp.ge.s32.totalorder %v339_v1, 2  ;;  %vm147_vm1 = vcmp.ge.s32.totalorder %v344_v6, 2  ;;  %v83_v35 = vmin.f32 %v71_v22, 255.0  ;;  %v58_v47 = vld [vmem:[#allocation5 + $0x28] sm:$0xff]  ;;  %v59_v48 = vld [vmem:[#allocation5 + $0x30] sm:$0xff] }
  0x2e   :  { %v84_v36 = vmin.f32 %v72_v23, 255.0  ;;  %v85_v37 = vmin.f32 %v73_v24, 255.0  ;;  %v204_v38 = vround.rtne.f32 %v77_v28  ;;  %vm144_vm2 = vcmp.lt.s32.totalorder %v342_v5, 14  ;;  %v60_v53 = vld [vmem:[#allocation5 + $0x38] sm:$0xff]  ;;  %v61_v54 = vld [vmem:[#allocation5 + $0x40] sm:$0xff]  ;;  %v62_v55 = vld [vmem:[#allocation5 + $0x48] sm:$0xff] }
  0x2f   :  { %v86_v42 = vmin.f32 %v74_v25, 255.0  ;;  %v87_v43 = vmin.f32 %v75_v26, 255.0  ;;  %v88_v44 = vmin.f32 %v76_v27, 255.0  ;;  %v205_v45 = vround.rtne.f32 %v78_v29  ;;  %v63_v60 = vld [vmem:[#allocation5 + $0x50] sm:$0xff]  ;;  %v64_v61 = vld [vmem:[#allocation5 + $0x58] sm:$0xff]  ;;  %vm148_vm4 = vmand %vm141_vm0, %vm147_vm1  ;;  %s267_s8 = scalar_lea.vmem %s195_s6, 128 }
  0x30   :  { %v206_v49 = vround.rtne.f32 %v79_v30  ;;  %v207_v50 = vround.rtne.f32 %v80_v31  ;;  %v208_v51 = vround.rtne.f32 %v81_v32  ;;  %v209_v52 = vround.rtne.f32 %v82_v33  ;;  %vm149_vm5 = vmand %vm144_vm2, %vm147_vm1  ;;  %p268_p2 = scmp.ne.s32.totalorder %s195_s6, %s267_s8  ;;  %p273_p4 = scmp.lt.s32.totalorder %s267_s8, %s267_s8 }
  0x31   :  { %vm150_vm3 = vcmp.lt.s32.totalorder %v344_v6, 14  ;;  %v210_v56 = vround.rtne.f32 %v83_v35  ;;  %v211_v57 = vround.rtne.f32 %v84_v36  ;;  %v212_v58 = vround.rtne.f32 %v85_v37 }
  0x32   :  { %v213_v59 = vround.rtne.f32 %v86_v42  ;;  %v214_v62 = vround.rtne.f32 %v87_v43  ;;  %v215_v63 = vround.rtne.f32 %v88_v44  ;;  %v101_v0 = vsub.f32 %v204_v38, %v53_v34  ;;  %vm151_vm6 = vmand %vm148_vm4, %vm150_vm3  ;;  %p274_p5 = por %p273_p4, %p272_p3 }
  0x33   :  { %v102_v2 = vsub.f32 %v205_v45, %v54_v39  ;;  %v103_v3 = vsub.f32 %v206_v49, %v55_v40  ;;  %v104_v4 = vsub.f32 %v207_v50, %v56_v41  ;;  %v105_v7 = vsub.f32 %v208_v51, %v57_v46  ;;  %vm152_vm7 = vmand %vm149_vm5, %vm150_vm3 }
  0x34   :  { %v106_v8 = vsub.f32 %v209_v52, %v58_v47  ;;  %v107_v9 = vsub.f32 %v210_v56, %v59_v48  ;;  %v108_v10 = vsub.f32 %v211_v57, %v60_v53  ;;  %v109_v11 = vsub.f32 %v212_v58, %v61_v54  ;;  %p275_p6 = pnand %p274_p5, %p268_p2 }
  0x35   :  { %v110_v12 = vsub.f32 %v213_v59, %v62_v55  ;;  %v111_v13 = vsub.f32 %v214_v62, %v63_v60  ;;  %v112_v14 = vsub.f32 %v215_v63, %v64_v61  ;;  %v113_v15 = vmul.f32 0.0010070159, %v101_v0 }
  0x36   :  { %v114_v16 = vmul.f32 0.0010070159, %v102_v2  ;;  %v115_v17 = vmul.f32 0.0010070159, %v107_v9  ;;  %v116_v18 = vmul.f32 0.0010070159, %v108_v10 }
  0x37   :  { %v117_v19 = vmul.f32 0.0019769762, %v103_v3  ;;  %v118_v20 = vmul.f32 0.0019769762, %v104_v4  ;;  %v119_v21 = vmul.f32 0.0019769762, %v109_v11 }
  0x38   :  { %v120_v22 = vmul.f32 0.0019769762, %v110_v12  ;;  %v125_v24 = vmul.f32 0.00038394608, %v105_v7  ;;  %v126_v25 = vmul.f32 0.00038394608, %v106_v8 }
  0x39   :  { %v121_v23 = vadd.f32 %v117_v19, %v113_v15  ;;  %v127_v26 = vmul.f32 0.00038394608, %v111_v13  ;;  %v122_v27 = vadd.f32 %v118_v20, %v114_v16  ;;  %v123_v28 = vadd.f32 %v119_v21, %v115_v17 }
  0x3a   :  { %v124_v29 = vadd.f32 %v120_v22, %v116_v18  ;;  %v128_v30 = vmul.f32 0.00038394608, %v112_v14  ;;  %vm182_vm9 = vcmp.eq.s32.totalorder %v339_v1, 0  ;;  %vm183_vm10 = vcmp.eq.s32.totalorder %v344_v6, 0 }
  0x3b   :  { %v129_v31 = vadd.f32 %v125_v24, %v121_v23  ;;  %v130_v32 = vadd.f32 %v126_v25, %v122_v27  ;;  %v131_v33 = vadd.f32 %v127_v26, %v123_v28  ;;  %vm184_vm11 = vmand %vm182_vm9, %vm183_vm10 }
  0x3c   :  { %v132_v34 = vadd.f32 %v128_v30, %v124_v29 }
  0x3d   :  { %v153_v35 = vmul.f32 %v129_v31, %v129_v31  ;;  %v154_v36 = vmul.f32 %v130_v32, %v130_v32  ;;  %v155_v37 = vmul.f32 %v131_v33, %v131_v33 }
  0x3e   :  { %v156_v38 = vmul.f32 %v132_v34, %v132_v34 }
  0x3f   :  { %v161_v39 = vsel %vm151_vm6, %v153_v35, 0.0  ;;  %v162_v40 = vsel %vm152_vm7, %v154_v36, 0.0  ;;  %v163_v41 = vsel %vm151_vm6, %v155_v37, 0.0 }
  0x40   :  { %v164_v5 = vsel %vm152_vm7, %v156_v38, 0.0  ;;  %v166_v42 = vsel %vm165_vm8, %v161_v39, 0.0  ;;  %v167_v43 = vsel %vm165_vm8, %v162_v40, 0.0  ;;  %v169_v44 = vsel %vm165_vm8, %v163_v41, 0.0 }
  0x41   :  { %v168_v45 = vadd.f32 %v167_v43, %v166_v42  ;;  %v171_v46 = vsel %vm165_vm8, %v164_v5, 0.0 }
  0x43   :  { %v170_v47 = vadd.f32 %v169_v44, %v168_v45 }
  0x45   :  { %v172_v48 = vadd.f32 %v171_v46, %v170_v47 }
  0x47   :  { %173 = vadd.xlane.f32.xlu0 %v172_v48 }
  0xd4   :  { %v174_v49 = vpop.xlane.xlu0 %173 }
  0xd5   :  { %v175_v50 = vrot.slane %v174_v49, 4 }
  0xd7   :  { %v176_v51 = vadd.f32 %v175_v50, %v174_v49 }
  0xd9   :  { %v177_v52 = vrot.slane %v176_v51, 2 }
  0xdb   :  { %v178_v53 = vadd.f32 %v177_v52, %v176_v51 }
  0xdd   :  { %v179_v54 = vrot.slane %v178_v53, 1 }
  0xdf   :  { %v180_v55 = vadd.f32 %v179_v54, %v178_v53 }
  0xe1   :  { %216 = vpush %v180_v55 }
 0x112   :  { %s217_s7 = spop %216 }
 0x113   :  { %v185_v56 = vstv %s217_s7 }
 0x114   :  { %v186_v57 = vsel %vm184_vm11, %v185_v56, 0.0 }
 0x115   :  { %187 = vst [vmem:[#allocation7] sm:$0xff] %v186_v57 }
 0x116   :  { %278 = shalt.err (!%p275_p6)
}
 0x117   :  { %s279_s11 = scalar_lea.hbm %s378_s2, 128 }
 0x118   :  { %p280_p7 = scmp.ne.s32.totalorder %s378_s2, %s279_s11  ;;  %p283_p8 = scmp.lt.u32.totalorder %s279_s11, %s378_s2 }
 0x11a   :  { %p285_p9 = pnand %p283_p8, %p280_p7 }
 0x11c   :  { %288 = shalt.err (!%p285_p9)
}
 0x11d   :  { %197 = dma.vmem_to_hbm [thread:$0]  %s195_s6, 128, %s378_s2, [#allocation4]  }
 0x11e   :  { %293 = dma.done.wait [#allocation4], 128  }
 0x11f   :  { %294 = vsyncadd [#allocation4], 4294967168 }
 0x120   :  { %201 = vsyncpa [#allocation3], 1 }
 0x121   :  { %202 = vsyncpa [#allocation6], 1 }
 0x122   :  { %203 = vsyncpa [#allocation4], 1 }

</bundles_post_ra>
